<compile_context>
chip_gen: v7x
topology: tpu7x:2x2x1
jax: 0.10.0
libtpu: 0.0.40
codegen_flags: <defaults>
</compile_context>

<pallas_src>
import jax
import jax.numpy as jnp
from jax.experimental import pallas as pl
from jax.experimental.pallas import tpu as pltpu

INPUT_SIZE = 768
HIDDEN = 128
NUM_CLASSES = 2
NUM_GATES = 3          # i | g | o  (forget gate eliminated: f * c0 == 0)
TB_MAX = 1024          # batch tile (a few MB of VMEM even double-buffered)


def _round_up(n, m):
    return ((n + m - 1) // m) * m


def lstm_fc_kernel(x_ref, w_ih_ref, b_gate_ref, w_fc_ref, b_fc_ref, out_ref):
    # f32 x tile -> bf16 right before the MXU (cast hides under the matmul).
    x = x_ref[...].astype(jnp.bfloat16)                              # [TB, 768]

    # Single LSTM step, zero initial state; only i|g|o gate columns exist.
    gates = jnp.dot(x, w_ih_ref[...],
                    preferred_element_type=jnp.float32) + b_gate_ref[...]   # [TB, 384] f32

    # Gate math stays f32 (v5e has no bf16 VPU/EUP path).
    i_g = jax.nn.sigmoid(gates[:, 0 * HIDDEN:1 * HIDDEN])
    g_g = jnp.tanh(gates[:, 1 * HIDDEN:2 * HIDDEN])
    o_g = jax.nn.sigmoid(gates[:, 2 * HIDDEN:3 * HIDDEN])

    c1 = i_g * g_g                                                   # f_g * c0 == 0
    h1 = o_g * jnp.tanh(c1)                                          # [TB, 128] f32

    # Lane-dense FC head on the MXU: bf16 x bf16 -> f32 accumulate.
    out = jnp.dot(h1.astype(jnp.bfloat16), w_fc_ref[...],
                  preferred_element_type=jnp.float32) + b_fc_ref[...]       # [TB, 128]
    out_ref[...] = out.astype(out_ref.dtype)                         # bf16 store


@jax.jit
def lstm_model_forward(x, w_ih_t, b_gate, w_fc_t, b_fc):
    B = x.shape[0]
    # Batch tile: multiple of 8 (f32 sublane), capped at TB_MAX; ragged last
    # block handled by Pallas (no wrapper-side jnp.pad over x).
    TB = min(TB_MAX, _round_up(B, 8))
    grid = (pl.cdiv(B, TB),)

    # On 2-TC chips (v7x) "parallel" duplicates the ~620 KB resident-weight DMA
    # per core; only worth it once per-core x bytes dominate.
    semantics = ("parallel",) if B > 512 else ("arbitrary",)

    weight_bytes = (w_ih_t.size * w_ih_t.dtype.itemsize
                    + b_gate.size * b_gate.dtype.itemsize
                    + w_fc_t.size * w_fc_t.dtype.itemsize
                    + b_fc.size * b_fc.dtype.itemsize)
    cost = pl.CostEstimate(
        flops=2 * B * INPUT_SIZE * NUM_GATES * HIDDEN
              + 2 * B * HIDDEN * HIDDEN,
        transcendentals=4 * B * HIDDEN,                  # 2 sigmoid + 2 tanh
        bytes_accessed=B * INPUT_SIZE * 4 + weight_bytes + B * HIDDEN * 2,
    )

    out_full = pl.pallas_call(
        lstm_fc_kernel,
        out_shape=jax.ShapeDtypeStruct((B, HIDDEN), jnp.bfloat16),
        grid=grid,
        in_specs=[
            pl.BlockSpec((TB, INPUT_SIZE), lambda i: (i, 0)),             # x tile (f32)
            pl.BlockSpec((INPUT_SIZE, NUM_GATES * HIDDEN), lambda i: (0, 0)),  # W_ih^T bf16 (resident)
            pl.BlockSpec((1, NUM_GATES * HIDDEN), lambda i: (0, 0)),      # gate bias f32
            pl.BlockSpec((HIDDEN, HIDDEN), lambda i: (0, 0)),             # W_fc^T bf16 padded
            pl.BlockSpec((1, HIDDEN), lambda i: (0, 0)),                  # fc bias f32 padded
        ],
        out_specs=pl.BlockSpec((TB, HIDDEN), lambda i: (i, 0)),
        compiler_params=pltpu.CompilerParams(dimension_semantics=semantics),
        cost_estimate=cost,
    )(x, w_ih_t, b_gate, w_fc_t, b_fc)

    # Drop the zero-padded class lanes; return f32 logits like PyTorch.
    return out_full[:, :NUM_CLASSES].astype(jnp.float32)


def init_params(key):
    """PyTorch-style uniform(-k, k) init. Returns (kernel_params, raw_f32_params)."""
    k = 1.0 / jnp.sqrt(jnp.float32(HIDDEN))
    ks = jax.random.split(key, 6)
    w_ih = jax.random.uniform(ks[0], (4 * HIDDEN, INPUT_SIZE), jnp.float32, -k, k)
    w_hh = jax.random.uniform(ks[1], (4 * HIDDEN, HIDDEN), jnp.float32, -k, k)
    b_ih = jax.random.uniform(ks[2], (4 * HIDDEN,), jnp.float32, -k, k)
    b_hh = jax.random.uniform(ks[3], (4 * HIDDEN,), jnp.float32, -k, k)
    w_fc = jax.random.uniform(ks[4], (NUM_CLASSES, HIDDEN), jnp.float32, -k, k)
    b_fc = jax.random.uniform(ks[5], (NUM_CLASSES,), jnp.float32, -k, k)
    raw = dict(w_ih=w_ih, w_hh=w_hh, b_ih=b_ih, b_hh=b_hh, w_fc=w_fc, b_fc=b_fc)

    # Keep only i | g | o gate rows (PyTorch order i,f,g,o); drop dead f gate.
    keep = jnp.concatenate([jnp.arange(0, HIDDEN),                 # i
                            jnp.arange(2 * HIDDEN, 3 * HIDDEN),    # g
                            jnp.arange(3 * HIDDEN, 4 * HIDDEN)])   # o
    w_ih_t = jnp.transpose(w_ih[keep]).astype(jnp.bfloat16)        # [768, 384] bf16
    b_gate = (b_ih + b_hh)[keep].reshape(1, NUM_GATES * HIDDEN)    # [1, 384] f32

    # Lane-dense FC: pad 2 classes out to 128 lanes, store bf16.
    w_fc_t = jnp.zeros((HIDDEN, HIDDEN), jnp.float32)
    w_fc_t = w_fc_t.at[:, :NUM_CLASSES].set(jnp.transpose(w_fc)).astype(jnp.bfloat16)
    b_fc_pad = jnp.zeros((1, HIDDEN), jnp.float32)
    b_fc_pad = b_fc_pad.at[0, :NUM_CLASSES].set(b_fc)              # [1, 128] f32

    return (w_ih_t, b_gate, w_fc_t, b_fc_pad), raw


def reference_forward_bf16(x, w_ih_t, b_gate, w_fc_t, b_fc):
    """Pure-JAX reference using the same bf16 weight/input representation."""
    gates = jnp.dot(x.astype(jnp.bfloat16), w_ih_t,
                    preferred_element_type=jnp.float32) + b_gate
    i_g = jax.nn.sigmoid(gates[:, 0 * HIDDEN:1 * HIDDEN])
    g_g = jnp.tanh(gates[:, 1 * HIDDEN:2 * HIDDEN])
    o_g = jax.nn.sigmoid(gates[:, 2 * HIDDEN:3 * HIDDEN])
    h1 = o_g * jnp.tanh(i_g * g_g)
    out = jnp.dot(h1.astype(jnp.bfloat16), w_fc_t,
                  preferred_element_type=jnp.float32) + b_fc
    return out[:, :NUM_CLASSES]


def reference_forward_f32(x, raw):
    """Full-precision PyTorch-equivalent LSTM step (seq_len=1, zero init state)."""
    gates = x @ raw["w_ih"].T + raw["b_ih"] + raw["b_hh"]   # h0 @ w_hh^T == 0
    i = jax.nn.sigmoid(gates[:, 0 * HIDDEN:1 * HIDDEN])
    f = jax.nn.sigmoid(gates[:, 1 * HIDDEN:2 * HIDDEN])
    g = jnp.tanh(gates[:, 2 * HIDDEN:3 * HIDDEN])
    o = jax.nn.sigmoid(gates[:, 3 * HIDDEN:4 * HIDDEN])
    c1 = f * 0.0 + i * g                                      # c0 == 0
    h1 = o * jnp.tanh(c1)
    return h1 @ raw["w_fc"].T + raw["b_fc"]


if __name__ == "__main__":
    key = jax.random.PRNGKey(0)
    k_x, k_p = jax.random.split(key)
    params, raw = init_params(k_p)

    # B=2 (the original demo shape) plus one ragged batch to exercise the
    # cdiv / partial-block path.
    for B in (2, 37):
        x = jax.random.normal(jax.random.fold_in(k_x, B), (B, INPUT_SIZE),
                              jnp.float32)
        out = jax.block_until_ready(lstm_model_forward(x, *params))
        assert out.shape == (B, NUM_CLASSES)

        ref_bf16 = reference_forward_bf16(x, *params)
        err_bf16 = jnp.max(jnp.abs(out - ref_bf16))
        assert jnp.allclose(out, ref_bf16, atol=1e-2, rtol=1e-2), (
            f"B={B}: bf16-path max abs err = {err_bf16}")

        ref_f32 = reference_forward_f32(x, raw)
        err_f32 = jnp.max(jnp.abs(out - ref_f32))
        assert jnp.allclose(out, ref_f32, atol=3e-2, rtol=3e-2), (
            f"B={B}: f32-reference max abs err = {err_f32}")

    print("KERNEL_OK")
</pallas_src>

<mosaic_0001>
module attributes {stable_mosaic.version = 11 : i64} {
  func.func @lstm_fc_kernel(%arg0: i32, %arg1: memref<8x768xf32, #tpu.memory_space<vmem>>, %arg2: memref<768x384xbf16, #tpu.memory_space<vmem>>, %arg3: memref<1x384xf32, #tpu.memory_space<vmem>>, %arg4: memref<128x128xbf16, #tpu.memory_space<vmem>>, %arg5: memref<1x128xf32, #tpu.memory_space<vmem>>, %arg6: memref<8x128xbf16, #tpu.memory_space<vmem>>) attributes {dimension_semantics = [#tpu.dimension_semantics<arbitrary>], iteration_bounds = array<i64: 1>, scalar_prefetch = 0 : i64, scratch_operands = 0 : i64, tpu.core_type = #tpu.core_type<tc>, window_params = [{transform_indices = @transform_0, window_bounds = array<i64: 8, 768>}, {pipeline_mode = #tpu.pipeline_mode<synchronous>, transform_indices = @transform_1, window_bounds = array<i64: 768, 384>}, {pipeline_mode = #tpu.pipeline_mode<synchronous>, transform_indices = @transform_2, window_bounds = array<i64: 1, 384>}, {pipeline_mode = #tpu.pipeline_mode<synchronous>, transform_indices = @transform_3, window_bounds = array<i64: 128, 128>}, {pipeline_mode = #tpu.pipeline_mode<synchronous>, transform_indices = @transform_4, window_bounds = array<i64: 1, 128>}, {transform_indices = @transform_5, window_bounds = array<i64: 8, 128>}]} {
    %c0 = arith.constant 0 : index
    %c0_0 = arith.constant 0 : index
    %0 = vector.load %arg1[%c0, %c0_0] : memref<8x768xf32, #tpu.memory_space<vmem>>, vector<8x768xf32>
    %1 = arith.truncf %0 : vector<8x768xf32> to vector<8x768xbf16>
    %c0_1 = arith.constant 0 : index
    %c0_2 = arith.constant 0 : index
    %2 = vector.load %arg2[%c0_1, %c0_2] : memref<768x384xbf16, #tpu.memory_space<vmem>>, vector<768x384xbf16>
    %cst = arith.constant dense<0.000000e+00> : vector<8x384xf32>
    %3 = tpu.matmul %1, %2, %cst {dimension_numbers = #tpu.dot_dimension_numbers<[1], [0], [0], [1], [0, 0, 1, 1], [], []>} : vector<8x768xbf16>, vector<768x384xbf16>, vector<8x384xf32> -> vector<8x384xf32>
    %c0_3 = arith.constant 0 : index
    %c0_4 = arith.constant 0 : index
    %4 = vector.load %arg3[%c0_3, %c0_4] : memref<1x384xf32, #tpu.memory_space<vmem>>, vector<1x384xf32>
    %5 = vector.broadcast %4 : vector<1x384xf32> to vector<8x384xf32>
    %6 = arith.addf %3, %5 : vector<8x384xf32>
    %7 = vector.extract_strided_slice %6 {offsets = [0, 0], sizes = [8, 128], strides = [1, 1]} : vector<8x384xf32> to vector<8x128xf32>
    %8 = arith.negf %7 : vector<8x128xf32>
    %9 = math.exp %8 : vector<8x128xf32>
    %cst_5 = arith.constant 1.000000e+00 : f32
    %10 = vector.broadcast %cst_5 : f32 to vector<8x128xf32>
    %11 = arith.addf %10, %9 : vector<8x128xf32>
    %12 = arith.divf %10, %11 : vector<8x128xf32>
    %13 = vector.extract_strided_slice %6 {offsets = [0, 128], sizes = [8, 128], strides = [1, 1]} : vector<8x384xf32> to vector<8x128xf32>
    %14 = math.tanh %13 : vector<8x128xf32>
    %15 = vector.extract_strided_slice %6 {offsets = [0, 256], sizes = [8, 128], strides = [1, 1]} : vector<8x384xf32> to vector<8x128xf32>
    %16 = arith.negf %15 : vector<8x128xf32>
    %17 = math.exp %16 : vector<8x128xf32>
    %cst_6 = arith.constant 1.000000e+00 : f32
    %18 = vector.broadcast %cst_6 : f32 to vector<8x128xf32>
    %19 = arith.addf %18, %17 : vector<8x128xf32>
    %20 = arith.divf %18, %19 : vector<8x128xf32>
    %21 = arith.mulf %12, %14 : vector<8x128xf32>
    %22 = math.tanh %21 : vector<8x128xf32>
    %23 = arith.mulf %20, %22 : vector<8x128xf32>
    %24 = arith.truncf %23 : vector<8x128xf32> to vector<8x128xbf16>
    %c0_7 = arith.constant 0 : index
    %c0_8 = arith.constant 0 : index
    %25 = vector.load %arg4[%c0_7, %c0_8] : memref<128x128xbf16, #tpu.memory_space<vmem>>, vector<128x128xbf16>
    %cst_9 = arith.constant dense<0.000000e+00> : vector<8x128xf32>
    %26 = tpu.matmul %24, %25, %cst_9 {dimension_numbers = #tpu.dot_dimension_numbers<[1], [0], [0], [1], [0, 0, 1, 1], [], []>} : vector<8x128xbf16>, vector<128x128xbf16>, vector<8x128xf32> -> vector<8x128xf32>
    %c0_10 = arith.constant 0 : index
    %c0_11 = arith.constant 0 : index
    %27 = vector.load %arg5[%c0_10, %c0_11] : memref<1x128xf32, #tpu.memory_space<vmem>>, vector<1x128xf32>
    %28 = vector.broadcast %27 : vector<1x128xf32> to vector<8x128xf32>
    %29 = arith.addf %26, %28 : vector<8x128xf32>
    %30 = arith.truncf %29 : vector<8x128xf32> to vector<8x128xbf16>
    %c0_12 = arith.constant 0 : index
    %c0_13 = arith.constant 0 : index
    %31 = vector.load %arg6[%c0_12, %c0_13] : memref<8x128xbf16, #tpu.memory_space<vmem>>, vector<8x128xbf16>
    tpu.vector_store %arg6[%c0_12, %c0_13], %30 {strides = array<i32>} : memref<8x128xbf16, #tpu.memory_space<vmem>>, vector<8x128xbf16>,
    return
  }
  func.func @transform_0(%arg0: i32) -> (i32, i32) {
    %c0_i32 = arith.constant 0 : i32
    %c0_i32_0 = arith.constant 0 : i32
    return %arg0, %c0_i32 : i32, i32
  }
  func.func @transform_1(%arg0: i32) -> (i32, i32) {
    %c0_i32 = arith.constant 0 : i32
    %c0_i32_0 = arith.constant 0 : i32
    %c0_i32_1 = arith.constant 0 : i32
    return %c0_i32, %c0_i32_0 : i32, i32
  }
  func.func @transform_2(%arg0: i32) -> (i32, i32) {
    %c0_i32 = arith.constant 0 : i32
    %c0_i32_0 = arith.constant 0 : i32
    %c0_i32_1 = arith.constant 0 : i32
    return %c0_i32, %c0_i32_0 : i32, i32
  }
  func.func @transform_3(%arg0: i32) -> (i32, i32) {
    %c0_i32 = arith.constant 0 : i32
    %c0_i32_0 = arith.constant 0 : i32
    %c0_i32_1 = arith.constant 0 : i32
    return %c0_i32, %c0_i32_0 : i32, i32
  }
  func.func @transform_4(%arg0: i32) -> (i32, i32) {
    %c0_i32 = arith.constant 0 : i32
    %c0_i32_0 = arith.constant 0 : i32
    %c0_i32_1 = arith.constant 0 : i32
    return %c0_i32, %c0_i32_0 : i32, i32
  }
  func.func @transform_5(%arg0: i32) -> (i32, i32) {
    %c0_i32 = arith.constant 0 : i32
    %c0_i32_0 = arith.constant 0 : i32
    return %arg0, %c0_i32 : i32, i32
  }
}

</mosaic_0001>

<bundles_post_ra>
// kernel: lstm_model_forward.1
= control target key start
LH: loop header
LB: loop body
LE: loop exit
PB: predicated region body
PF: predicated region fallthrough
CT: control target
= control target key end

     0   :  { %10 = vsyncpa [#allocation3], 0  ;;  %s2255_s0 = inlined_call_operand.hbm [shape: f32[2,768], index: 0, kind: input, shape index: {}]   ;;  %s2256_s1 = inlined_call_operand.hbm [shape: bf16[768,384], index: 1, kind: input, shape index: {}]   ;;  %s2257_s2 = inlined_call_operand.vmem [shape: f32[1,384], index: 2, kind: input, shape index: {}]   ;;  %s2258_s3 = inlined_call_operand.hbm [shape: bf16[128,128], index: 3, kind: input, shape index: {}]   ;;  %s2259_s4 = inlined_call_operand.vmem [shape: f32[1,128], index: 4, kind: input, shape index: {}]   ;;  %s2260_s5 = inlined_call_operand.vmem [shape: bf16[2,128], index: 5, kind: output, shape index: {}]  }
   0x1   :  { %11 = vsyncpa [#allocation5], 0 }
   0x2   :  { %16 = vsyncadd [#allocation3], 576  ;;  %s2130_s18 = smov [#allocation4]   ;;  %s2131_s20 = smov [#allocation2]  }
   0x3   :  { %s29_s19 = sshll.u32 %s2130_s18, 4  ;;  %s17_s21 = sshll.u32 %s2131_s20, 4  ;;  %s30_s19 = int_to_ptr.vmem [resolvable:$true] %s29_s19  ;;  %s2171_s21 = int_to_ptr.vmem [resolvable:$true] %s17_s21 }
   0x4   :  { %s2060_s24 = scalar_lea.hbm %s2256_s1, 18432 }
   0x5   :  { %p2061_p0 = scmp.ne.s32.totalorder %s2256_s1, %s2060_s24  ;;  %p2064_p1 = scmp.lt.u32.totalorder %s2060_s24, %s2256_s1 }
   0x7   :  { %p2066_p2 = pnand %p2064_p1, %p2061_p0 }
   0x9   :  { %2069 = shalt.err (!%p2066_p2)
}
   0xa   :  { %s2070_s29 = scalar_lea.vmem %s30_s19, 18432  ;;  %p2075_p4 = scmp.lt.s32.totalorder %s30_s19, %s30_s19 }
   0xb   :  { %p2071_p3 = scmp.ne.s32.totalorder %s30_s19, %s2070_s29  ;;  %p2076_p5 = scmp.lt.s32.totalorder %s2070_s29, %s2070_s29 }
   0xd   :  { %p2077_p6 = por %p2076_p5, %p2075_p4 }
   0xf   :  { %p2078_p7 = pnand %p2077_p6, %p2071_p3 }
  0x11   :  { %2081 = shalt.err (!%p2078_p7)
}
  0x12   :  { %s2132_s30 = smov 192   ;;  %s2133_s6 = smov 12  }
  0x13   :  { %35 = dma.hbm_to_vmem [thread:$0]  %s2256_s1, 18432, %s30_s19, [#allocation5], %s2132_s30, %s2132_s30, %s2133_s6  }
  0x14   :  { %s2082_s11 = scalar_lea.hbm %s2255_s0, 192 }
  0x15   :  { %p2083_p8 = scmp.ne.s32.totalorder %s2255_s0, %s2082_s11  ;;  %p2086_p9 = scmp.lt.u32.totalorder %s2082_s11, %s2255_s0 }
  0x17   :  { %p2088_p10 = pnand %p2086_p9, %p2083_p8 }
  0x19   :  { %2091 = shalt.err (!%p2088_p10)
}
  0x1a   :  { %s2092_s16 = scalar_lea.vmem %s2171_s21, 192  ;;  %s2096_s1 = scalar_lea.vmem %s2171_s21, 768 }
  0x1b   :  { %p2093_p11 = scmp.ne.s32.totalorder %s2171_s21, %s2092_s16  ;;  %p2097_p12 = scmp.lt.s32.totalorder %s2171_s21, %s2171_s21 }
  0x1c   :  { %p2098_p13 = scmp.lt.s32.totalorder %s2096_s1, %s2092_s16 }
  0x1e   :  { %p2099_p0 = por %p2098_p13, %p2097_p12 }
  0x20   :  { %p2100_p1 = pnand %p2099_p0, %p2093_p11 }
  0x22   :  { %2103 = shalt.err (!%p2100_p1)
}
  0x23   :  { %23 = dma.hbm_to_vmem [thread:$0]  %s2255_s0, 192, %s2171_s21, [#allocation3], %s2132_s30, %s2132_s30, %s2133_s6  }
  0x24   :  { %s2134_s19 = smov [#allocation6]   ;;  %s2104_s24 = scalar_lea.hbm %s2258_s3, 1024 }
  0x25   :  { %s43_s20 = sshll.u32 %s2134_s19, 4  ;;  %p2105_p2 = scmp.ne.s32.totalorder %s2258_s3, %s2104_s24  ;;  %s44_s20 = int_to_ptr.vmem [resolvable:$true] %s43_s20 }
  0x26   :  { %p2108_p3 = scmp.lt.u32.totalorder %s2104_s24, %s2258_s3 }
  0x28   :  { %p2110_p4 = pnand %p2108_p3, %p2105_p2 }
  0x2a   :  { %2113 = shalt.err (!%p2110_p4)
}
  0x2b   :  { %s2114_s29 = scalar_lea.vmem %s44_s20, 1024  ;;  %p2119_p6 = scmp.lt.s32.totalorder %s44_s20, %s44_s20 }
  0x2c   :  { %p2115_p5 = scmp.ne.s32.totalorder %s44_s20, %s2114_s29  ;;  %p2120_p7 = scmp.lt.s32.totalorder %s2114_s29, %s2114_s29 }
  0x2e   :  { %p2121_p8 = por %p2120_p7, %p2119_p6 }
  0x30   :  { %p2122_p9 = pnand %p2121_p8, %p2115_p5 }
  0x32   :  { %2125 = shalt.err (!%p2122_p9)
}
  0x33   :  { %s2135_s0 = smov 64   ;;  %s2136_s21 = smov 4  }
  0x34   :  { %49 = dma.hbm_to_vmem [thread:$0]  %s2258_s3, 1024, %s44_s20, [#allocation5], %s2135_s0, %s2135_s0, %s2136_s21  }
  0x35   :  { %2126 = dma.done.wait [#allocation3], 768  }
  0x36   :  { %2127 = vsyncadd [#allocation3], 4294966528 }
  0x37   :  { %2128 = dma.done.wait [#allocation5], 19456  }
  0x38   :  { %2129 = vsyncadd [#allocation5], 4294947840  ;;  %v1840_v0 = vld [vmem:[#allocation4 + $0x4] ss:$12 sps:$4 sm:$0xff]   ;;  %v1842_v1 = vld [vmem:[#allocation4] ss:$12 sps:$4 sm:$0xff]   ;;  %v85_v17 = vlaneseq }
  0x39   :  { %1121 = vmatprep.subr.bf16.mxu0 %v1840_v0  ;;  %v1843_v2 = vld [vmem:[#allocation4 + $0x1c] ss:$12 sps:$4 sm:$0xff]   ;;  %v1845_v3 = vld [vmem:[#allocation4 + $0x18] ss:$12 sps:$4 sm:$0xff]   ;;  %v1846_v4 = vld [vmem:[#allocation4 + $0x34] ss:$12 sps:$4 sm:$0xff]  }
  0x3a   :  { %1122 = vmatpush1.bf16.msra.mxu0 %v1842_v1  ;;  %v1848_v5 = vld [vmem:[#allocation4 + $0x30] ss:$12 sps:$4 sm:$0xff]   ;;  %v1849_v6 = vld [vmem:[#allocation4 + $0x4c] ss:$12 sps:$4 sm:$0xff]   ;;  %v1851_v7 = vld [vmem:[#allocation4 + $0x48] ss:$12 sps:$4 sm:$0xff]  }
  0x3b   :  { %1123 = vmatprep.subr.bf16.mxu0 %v1843_v2  ;;  %v1852_v8 = vld [vmem:[#allocation4 + $0x64] ss:$12 sps:$4 sm:$0xff]   ;;  %v1854_v9 = vld [vmem:[#allocation4 + $0x60] ss:$12 sps:$4 sm:$0xff]   ;;  %v1855_v10 = vld [vmem:[#allocation4 + $0x7c] ss:$12 sps:$4 sm:$0xff]  }
  0x3c   :  { %v1876_v11 = vld [vmem:[#allocation4 + $0xc8] ss:$12 sps:$4 sm:$0xff]   ;;  %v1857_v13 = vld [vmem:[#allocation4 + $0x78] ss:$12 sps:$4 sm:$0xff]   ;;  %v1881_v15 = vld [vmem:[#allocation4 + $0xe0] ss:$12 sps:$4 sm:$0xff]  }
  0x3d   :  { %v1877_v12 = vld [vmem:[#allocation4 + $0x8] ss:$12 sps:$4 sm:$0xff]   ;;  %1724 = vmatprep.subr.bf16.mxu1 %v1876_v11  ;;  %v1882_v16 = vld [vmem:[#allocation4 + $0x20] ss:$12 sps:$4 sm:$0xff]   ;;  %v1860_v18 = vld [vmem:[#allocation4 + $0x90] ss:$12 sps:$4 sm:$0xff]  }
  0x3e   :  { %1124 = vmatpush1.bf16.msra.mxu0 %v1845_v3  ;;  %v1858_v14 = vld [vmem:[#allocation4 + $0x94] ss:$12 sps:$4 sm:$0xff]   ;;  %1725 = vmatpush3.bf16.msra.mxu1 %v1877_v12  ;;  %v1861_v19 = vld [vmem:[#allocation4 + $0xac] ss:$12 sps:$4 sm:$0xff]   ;;  %v2137_v20 = vmov 1983009808  }
  0x3f   :  { %1125 = vmatprep.subr.bf16.mxu0 %v1846_v4  ;;  %1726 = vmatprep.subr.bf16.mxu1 %v1881_v15  ;;  %v83_v21 = vunpack.c.l.s4 %v2137_v20  ;;  %v1886_v22 = vld [vmem:[#allocation4 + $0xf8] ss:$12 sps:$4 sm:$0xff]   ;;  %v1863_v24 = vld [vmem:[#allocation4 + $0xa8] ss:$12 sps:$4 sm:$0xff]   ;;  %v2215_v25 = vshrl.u32 %v85_v17, 7  ;;  %vm2139_vm0 = vmmov 0  }
  0x40   :  { %v1887_v23 = vld [vmem:[#allocation4 + $0x38] ss:$12 sps:$4 sm:$0xff]   ;;  %v1891_v26 = vld [vmem:[#allocation4 + $0x110] ss:$12 sps:$4 sm:$0xff]   ;;  %v1866_v30 = vld [vmem:[#allocation4 + $0xc0] ss:$12 sps:$4 sm:$0xff]  }
  0x41   :  { %v84_v27 = vunpack.c.0.s8 %v83_v21  ;;  %v1892_v28 = vld [vmem:[#allocation4 + $0x50] ss:$12 sps:$4 sm:$0xff]   ;;  %v1896_v32 = vld [vmem:[#allocation4 + $0x128] ss:$12 sps:$4 sm:$0xff]   ;;  %v1869_v36 = vld [vmem:[#allocation4 + $0xd8] ss:$12 sps:$4 sm:$0xff]  }
  0x42   :  { %1126 = vmatpush1.bf16.msra.mxu0 %v1848_v5  ;;  %1727 = vmatpush3.bf16.msra.mxu1 %v1882_v16  ;;  %v1864_v29 = vld [vmem:[#allocation4 + $0xc4] ss:$12 sps:$4 sm:$0xff]   ;;  %v1867_v31 = vld [vmem:[#allocation4 + $0xdc] ss:$12 sps:$4 sm:$0xff]   ;;  %v1870_v38 = vld [vmem:[#allocation4 + $0xf4] ss:$12 sps:$4 sm:$0xff]  }
  0x43   :  { %1127 = vmatprep.subr.bf16.mxu0 %v1849_v6  ;;  %1728 = vmatprep.subr.bf16.mxu1 %v1886_v22  ;;  %v2218_v33 = vsub.s32 %v84_v27, %v2215_v25  ;;  %v1897_v34 = vld [vmem:[#allocation4 + $0x68] ss:$12 sps:$4 sm:$0xff]   ;;  %v1898_v35 = vld [vmem:[#allocation2] ss:$12 sps:$4 sm:$0xff]   ;;  %v1903_v41 = vld [vmem:[#allocation2 + $0x1c] ss:$12 sps:$4 sm:$0xff]  }
  0x44   :  { %v1901_v37 = vld [vmem:[#allocation2 + $0x18] ss:$12 sps:$4 sm:$0xff]   ;;  %v1907_v43 = vld [vmem:[#allocation4 + $0x140] ss:$12 sps:$4 sm:$0xff]   ;;  %v1872_v46 = vld [vmem:[#allocation4 + $0xf0] ss:$12 sps:$4 sm:$0xff]  }
  0x45   :  { %v88_v39 = vrot.slane %v1898_v35, %v2218_v33  ;;  %v1900_v40 = vld [vmem:[#allocation2 + $0x4] ss:$12 sps:$4 sm:$0xff]   ;;  %v102_v42 = vrot.slane %v1901_v37, %v2218_v33  ;;  %v1873_v47 = vld [vmem:[#allocation4 + $0x10c] ss:$12 sps:$4 sm:$0xff]   ;;  %v2226_v53 = vrot.slane %v1903_v41, %v2218_v33  ;;  %v1917_v54 = vld [vmem:[#allocation4 + $0x170] ss:$12 sps:$4 sm:$0xff]  }
  0x46   :  { %1128 = vmatpush1.bf16.msra.mxu0 %v1851_v7  ;;  %1729 = vmatpush3.bf16.msra.mxu1 %v1887_v23  ;;  %v1908_v45 = vld [vmem:[#allocation4 + $0x80] ss:$12 sps:$4 sm:$0xff]   ;;  %v1912_v49 = vld [vmem:[#allocation4 + $0x158] ss:$12 sps:$4 sm:$0xff]   ;;  %v1875_v51 = vld [vmem:[#allocation4 + $0x108] ss:$12 sps:$4 sm:$0xff]   ;;  %v2223_v52 = vrot.slane %v1900_v40, %v2218_v33 }
  0x47   :  { %1129 = vmatprep.subr.bf16.mxu0 %v1852_v8  ;;  %1730 = vmatprep.subr.bf16.mxu1 %v1891_v26  ;;  %v111_v44 = vcombine.high %v88_v39, %v102_v42  ;;  %v1913_v50 = vld [vmem:[#allocation4 + $0x98] ss:$12 sps:$4 sm:$0xff]   ;;  %v1918_v55 = vld [vmem:[#allocation4 + $0xb0] ss:$12 sps:$4 sm:$0xff]   ;;  %v110_v57 = vcombine.low %v88_v39, %v102_v42  ;;  %v1880_v58 = vld [vmem:[#allocation4 + $0x120] ss:$12 sps:$4 sm:$0xff]  }
  0x48   :  { %v1878_v56 = vld [vmem:[#allocation4 + $0x124] ss:$12 sps:$4 sm:$0xff]   ;;  %v113_v59 = vcombine.high %v2223_v52, %v2226_v53  ;;  %v1922_v60 = vld [vmem:[#allocation4 + $0x248] ss:$12 sps:$4 sm:$0xff]   ;;  %v1927_v0 = vld [vmem:[#allocation4 + $0x260] ss:$12 sps:$4 sm:$0xff]  }
  0x49   :  { %v139_v48 = vpack.c.bf16 %v111_v44, %v111_v44  ;;  %v1923_v61 = vld [vmem:[#allocation4 + $0x188] ss:$12 sps:$4 sm:$0xff]   ;;  %v138_v63 = vpack.c.bf16 %v110_v57, %v110_v57  ;;  %v1885_v2 = vld [vmem:[#allocation4 + $0x138] ss:$12 sps:$4 sm:$0xff]   ;;  %v1928_v4 = vld [vmem:[#allocation4 + $0x1a0] ss:$12 sps:$4 sm:$0xff]  }
  0x4a   :  { %1130 = vmatpush1.bf16.msra.mxu0 %v1854_v9  ;;  %1731 = vmatpush3.bf16.msra.mxu1 %v1892_v28  ;;  %v1883_v62 = vld [vmem:[#allocation4 + $0x13c] ss:$12 sps:$4 sm:$0xff]   ;;  %v141_v1 = vpack.c.bf16 %v113_v59, %v113_v59  ;;  %v1888_v3 = vld [vmem:[#allocation4 + $0x154] ss:$12 sps:$4 sm:$0xff]   ;;  %v1932_v5 = vld [vmem:[#allocation4 + $0x278] ss:$12 sps:$4 sm:$0xff]  }
  0x4b   :  { %1131 = vmatprep.subr.bf16.mxu0 %v1855_v10  ;;  %1732 = vmatprep.subr.bf16.mxu1 %v1896_v32  ;;  %v1890_v6 = vld [vmem:[#allocation4 + $0x150] ss:$12 sps:$4 sm:$0xff]   ;;  %v1893_v7 = vld [vmem:[#allocation4 + $0x16c] ss:$12 sps:$4 sm:$0xff]   ;;  %v1895_v10 = vld [vmem:[#allocation4 + $0x168] ss:$12 sps:$4 sm:$0xff]  }
  0x4c   :  { %1153 = vmatprep.mubr.bf16.mxu0 %v139_v48  ;;  %1276 = vmatprep.mubr.bf16.mxu1 %v139_v48  ;;  %v1933_v8 = vld [vmem:[#allocation4 + $0x1b8] ss:$12 sps:$4 sm:$0xff]   ;;  %v1937_v9 = vld [vmem:[#allocation4 + $0x290] ss:$12 sps:$4 sm:$0xff]   ;;  %v1943_v16 = vld [vmem:[#allocation4 + $0x1e8] ss:$12 sps:$4 sm:$0xff]  }
  0x4d   :  { %v1906_v11 = vld [vmem:[#allocation4 + $0x184] ss:$12 sps:$4 sm:$0xff]   ;;  %v1911_v15 = vld [vmem:[#allocation4 + $0x19c] ss:$12 sps:$4 sm:$0xff]   ;;  %v1947_v17 = vld [vmem:[#allocation4 + $0x2c0] ss:$12 sps:$4 sm:$0xff]  }
  0x4e   :  { %1132 = vmatpush1.bf16.msra.mxu0 %v1857_v13  ;;  %1733 = vmatpush3.bf16.msra.mxu1 %v1897_v34  ;;  %v1938_v12 = vld [vmem:[#allocation4 + $0x1d0] ss:$12 sps:$4 sm:$0xff]   ;;  %v1942_v13 = vld [vmem:[#allocation4 + $0x2a8] ss:$12 sps:$4 sm:$0xff]   ;;  %v1952_v21 = vld [vmem:[#allocation4 + $0x2d8] ss:$12 sps:$4 sm:$0xff]  }
  0x4f   :  { %1133 = vmatprep.subr.bf16.mxu0 %v1858_v14  ;;  %1734 = vmatprep.subr.bf16.mxu1 %v1907_v43  ;;  %v1904_v14 = vld [vmem:[#allocation4 + $0x180] ss:$12 sps:$4 sm:$0xff]   ;;  %v1914_v22 = vld [vmem:[#allocation4 + $0x1b0] ss:$12 sps:$4 sm:$0xff]   ;;  %v1919_v27 = vld [vmem:[#allocation4 + $0x1c8] ss:$12 sps:$4 sm:$0xff]  }
  0x50   :  { %v1916_v20 = vld [vmem:[#allocation4 + $0x1b4] ss:$12 sps:$4 sm:$0xff]   ;;  %v1921_v23 = vld [vmem:[#allocation4 + $0x1cc] ss:$12 sps:$4 sm:$0xff]   ;;  %v1957_v26 = vld [vmem:[#allocation4 + $0x2f0] ss:$12 sps:$4 sm:$0xff]  }
  0x51   :  { %v1926_v28 = vld [vmem:[#allocation4 + $0x1e4] ss:$12 sps:$4 sm:$0xff]   ;;  %v1924_v32 = vld [vmem:[#allocation4 + $0x1e0] ss:$12 sps:$4 sm:$0xff]   ;;  %v1931_v34 = vld [vmem:[#allocation4 + $0x1fc] ss:$12 sps:$4 sm:$0xff]  }
  0x52   :  { %1134 = vmatpush1.bf16.msra.mxu0 %v1860_v18  ;;  %1735 = vmatpush3.bf16.msra.mxu1 %v1908_v45  ;;  %v1909_v18 = vld [vmem:[#allocation4 + $0x198] ss:$12 sps:$4 sm:$0xff]   ;;  %v1967_v37 = vld [vmem:[#allocation4 + $0x3e0] ss:$12 sps:$4 sm:$0xff]   ;;  %v1934_v42 = vld [vmem:[#allocation4 + $0x210] ss:$12 sps:$4 sm:$0xff]  }
  0x53   :  { %1135 = vmatprep.subr.bf16.mxu0 %v1861_v19  ;;  %1736 = vmatprep.subr.bf16.mxu1 %v1912_v49  ;;  %v1948_v19 = vld [vmem:[#allocation4 + $0x200] ss:$12 sps:$4 sm:$0xff]   ;;  %v1972_v41 = vld [vmem:[#allocation4 + $0x3f8] ss:$12 sps:$4 sm:$0xff]   ;;  %v1977_v45 = vld [vmem:[#allocation4 + $0x410] ss:$12 sps:$4 sm:$0xff]  }
  0x54   :  { %v1936_v39 = vld [vmem:[#allocation4 + $0x214] ss:$12 sps:$4 sm:$0xff]   ;;  %v1973_v43 = vld [vmem:[#allocation4 + $0x338] ss:$12 sps:$4 sm:$0xff]   ;;  %v1978_v48 = vld [vmem:[#allocation4 + $0x350] ss:$12 sps:$4 sm:$0xff]  }
  0x55   :  { %v1968_v40 = vld [vmem:[#allocation4 + $0x320] ss:$12 sps:$4 sm:$0xff]   ;;  %v1982_v49 = vld [vmem:[#allocation4 + $0x428] ss:$12 sps:$4 sm:$0xff]   ;;  %v1992_v57 = vld [vmem:[#allocation4 + $0x458] ss:$12 sps:$4 sm:$0xff]  }
  0x56   :  { %1136 = vmatpush1.bf16.msra.mxu0 %v1863_v24  ;;  %1737 = vmatpush3.bf16.msra.mxu1 %v1913_v50  ;;  %v1953_v24 = vld [vmem:[#allocation4 + $0x218] ss:$12 sps:$4 sm:$0xff]   ;;  %v1944_v50 = vld [vmem:[#allocation4 + $0x240] ss:$12 sps:$4 sm:$0xff]   ;;  %v2003_v59 = vld [vmem:[#allocation2 + $0x20] ss:$12 sps:$4 sm:$0xff]  }
  0x57   :  { %1137 = vmatprep.subr.bf16.mxu0 %v1864_v29  ;;  %1738 = vmatprep.subr.bf16.mxu1 %v1917_v54  ;;  %v112_v29 = vcombine.low %v2223_v52, %v2226_v53  ;;  %v1941_v44 = vld [vmem:[#allocation4 + $0x22c] ss:$12 sps:$4 sm:$0xff]   ;;  %v1983_v52 = vld [vmem:[#allocation4 + $0x368] ss:$12 sps:$4 sm:$0xff]  }
  0x58   :  { %v1987_v53 = vld [vmem:[#allocation4 + $0x440] ss:$12 sps:$4 sm:$0xff]   ;;  %v1949_v54 = vld [vmem:[#allocation4 + $0x258] ss:$12 sps:$4 sm:$0xff]  }
  0x59   :  { %v2232_v35 = vpack.c.bf16 %v112_v29, %v112_v29  ;;  %v2010_v29 = vld [vmem:[#allocation4 + $0x390] ss:$12 sps:$4 sm:$0xff]  }
  0x5a   :  { %1138 = vmatpush1.bf16.msra.mxu0 %v1866_v30  ;;  %1739 = vmatpush3.bf16.msra.mxu1 %v1918_v55  ;;  %v1958_v30 = vld [vmem:[#allocation4 + $0x230] ss:$12 sps:$4 sm:$0xff]   ;;  %v1956_v55 = vld [vmem:[#allocation4 + $0x274] ss:$12 sps:$4 sm:$0xff]  }
  0x5b   :  { %1139 = vmatprep.subr.bf16.mxu0 %v1867_v31  ;;  %1746 = vmatprep.subr.bf16.mxu1 %v1922_v60  ;;  %v1962_v31 = vld [vmem:[#allocation4 + $0x3c8] ss:$12 sps:$4 sm:$0xff]   ;;  %v1954_v60 = vld [vmem:[#allocation4 + $0x270] ss:$12 sps:$4 sm:$0xff]  }
  0x5d   :  { %1277 = vmatmul.mubr.bf16.vlgmr.msra.gmra.mrb[0].mxu1 %v138_v63 }
  0x5e   :  { %1140 = vmatpush1.bf16.msra.mxu0 %v1869_v36  ;;  %1747 = vmatpush3.bf16.msra.mxu1 %v1923_v61  ;;  %v1963_v36 = vld [vmem:[#allocation4 + $0x308] ss:$12 sps:$4 sm:$0xff]  }
  0x5f   :  { %1141 = vmatprep.subr.bf16.mxu0 %v1870_v38  ;;  %1748 = vmatprep.subr.bf16.mxu1 %v1927_v0  ;;  %v1929_v38 = vld [vmem:[#allocation4 + $0x1f8] ss:$12 sps:$4 sm:$0xff]  }
  0x60   :  { %1316 = vmatprep.mubr.bf16.mxu1 %v141_v1  ;;  %v1961_v0 = vld [vmem:[#allocation4 + $0x28c] ss:$12 sps:$4 sm:$0xff]  }
  0x62   :  { %1142 = vmatpush1.bf16.msra.mxu0 %v1872_v46  ;;  %1749 = vmatpush3.bf16.msra.mxu1 %v1928_v4  ;;  %v1939_v46 = vld [vmem:[#allocation4 + $0x228] ss:$12 sps:$4 sm:$0xff]  }
  0x63   :  { %1143 = vmatprep.subr.bf16.mxu0 %v1873_v47  ;;  %1750 = vmatprep.subr.bf16.mxu1 %v1932_v5  ;;  %v1946_v47 = vld [vmem:[#allocation4 + $0x244] ss:$12 sps:$4 sm:$0xff]  }
  0x66   :  { %1144 = vmatpush1.bf16.msra.mxu0 %v1875_v51  ;;  %1751 = vmatpush3.bf16.msra.mxu1 %v1933_v8  ;;  %v1951_v51 = vld [vmem:[#allocation4 + $0x25c] ss:$12 sps:$4 sm:$0xff]  }
  0x67   :  { %1145 = vmatprep.subr.bf16.mxu0 %v1878_v56  ;;  %1752 = vmatprep.subr.bf16.mxu1 %v1937_v9  ;;  %v1988_v56 = vld [vmem:[#allocation4 + $0x380] ss:$12 sps:$4 sm:$0xff]   ;;  %v1971_v9 = vld [vmem:[#allocation4 + $0x2bc] ss:$12 sps:$4 sm:$0xff]  }
  0x6a   :  { %1146 = vmatpush1.bf16.msra.mxu0 %v1880_v58  ;;  %1753 = vmatpush3.bf16.msra.mxu1 %v1938_v12  ;;  %v2002_v58 = vld [vmem:[#allocation2 + $0x8] ss:$12 sps:$4 sm:$0xff]   ;;  %v1974_v12 = vld [vmem:[#allocation4 + $0x2d0] ss:$12 sps:$4 sm:$0xff]  }
  0x6b   :  { %1147 = vmatprep.subr.bf16.mxu0 %v1883_v62  ;;  %1754 = vmatprep.subr.bf16.mxu1 %v1942_v13  ;;  %v122_v61 = vrot.slane %v2002_v58, %v2218_v33  ;;  %v129_v62 = vrot.slane %v2003_v59, %v2218_v33  ;;  %v1964_v33 = vld [vmem:[#allocation4 + $0x2a0] ss:$12 sps:$4 sm:$0xff]   ;;  %v2138_v58 = vmov 0.0  }
  0x6c   :  { %v1981_v13 = vld [vmem:[#allocation4 + $0x2ec] ss:$12 sps:$4 sm:$0xff]  }
  0x6d   :  { %v130_v5 = vcombine.low %v122_v61, %v129_v62 }
  0x6e   :  { %1148 = vmatpush1.bf16.msra.mxu0 %v1885_v2  ;;  %1755 = vmatpush3.bf16.msra.mxu1 %v1943_v16  ;;  %v131_v2 = vcombine.high %v122_v61, %v129_v62  ;;  %v1984_v16 = vld [vmem:[#allocation4 + $0x300] ss:$12 sps:$4 sm:$0xff]  }
  0x6f   :  { %1149 = vmatprep.subr.bf16.mxu0 %v1888_v3  ;;  %1756 = vmatprep.subr.bf16.mxu1 %v1947_v17  ;;  %v1959_v3 = vld [vmem:[#allocation4 + $0x288] ss:$12 sps:$4 sm:$0xff]   ;;  %v2237_v8 = vpack.c.bf16 %v130_v5, %v130_v5  ;;  %v2044_v5 = vld [vmem:[#allocation6 + $0x20] sm:$0xff]  }
  0x70   :  { %v143_v4 = vpack.c.bf16 %v131_v2, %v131_v2  ;;  %v1991_v17 = vld [vmem:[#allocation4 + $0x31c] ss:$12 sps:$4 sm:$0xff]  }
  0x71   :  { %v2041_v62 = vld [vmem:[#allocation6 + $0x8] sm:$0xff]  }
  0x72   :  { %1150 = vmatpush1.bf16.msra.mxu0 %v1890_v6  ;;  %1757 = vmatpush3.bf16.msra.mxu1 %v1948_v19  ;;  %v1998_v6 = vld [vmem:[#allocation4 + $0x3b0] ss:$12 sps:$4 sm:$0xff]   ;;  %v1996_v19 = vld [vmem:[#allocation4 + $0x334] ss:$12 sps:$4 sm:$0xff]  }
  0x73   :  { %1151 = vmatprep.subr.bf16.mxu0 %v1893_v7  ;;  %1758 = vmatprep.subr.bf16.mxu1 %v1952_v21  ;;  %v1966_v7 = vld [vmem:[#allocation4 + $0x2a4] ss:$12 sps:$4 sm:$0xff]   ;;  %v2001_v21 = vld [vmem:[#allocation4 + $0x34c] ss:$12 sps:$4 sm:$0xff]  }
  0x76   :  { %1152 = vmatpush1.bf16.msra.mxu0 %v1895_v10  ;;  %1759 = vmatpush3.bf16.msra.mxu1 %v1953_v24  ;;  %v1969_v10 = vld [vmem:[#allocation4 + $0x2b8] ss:$12 sps:$4 sm:$0xff]   ;;  %v2004_v24 = vld [vmem:[#allocation4 + $0x360] ss:$12 sps:$4 sm:$0xff]  }
  0x77   :  { %1162 = vmatprep.subr.bf16.mxu0 %v1906_v11  ;;  %1760 = vmatprep.subr.bf16.mxu1 %v1957_v26  ;;  %v1976_v11 = vld [vmem:[#allocation4 + $0x2d4] ss:$12 sps:$4 sm:$0xff]   ;;  %v2009_v26 = vld [vmem:[#allocation4 + $0x37c] ss:$12 sps:$4 sm:$0xff]  }
  0x79   :  { %1154 = vmatmul.mubr.bf16.vlgmr.msra.gmra.mrb[0].mxu0 %v138_v63  ;;  %v1993_v63 = vld [vmem:[#allocation4 + $0x398] ss:$12 sps:$4 sm:$0xff]  }
  0x7a   :  { %1163 = vmatpush1.bf16.msra.mxu0 %v1904_v14  ;;  %1194 = vmatprep.mubr.bf16.mxu0 %v141_v1  ;;  %v1997_v1 = vld [vmem:[#allocation4 + $0x470] ss:$12 sps:$4 sm:$0xff]   ;;  %v1979_v14 = vld [vmem:[#allocation4 + $0x2e8] ss:$12 sps:$4 sm:$0xff]  }
  0x7b   :  { %1164 = vmatprep.subr.bf16.mxu0 %v1911_v15  ;;  %1761 = vmatpush3.bf16.msra.mxu1 %v1958_v30  ;;  %v1986_v15 = vld [vmem:[#allocation4 + $0x304] ss:$12 sps:$4 sm:$0xff]   ;;  %v2015_v30 = vld [vmem:[#allocation4 + $0x3ac] ss:$12 sps:$4 sm:$0xff]  }
  0x7c   :  { %1768 = vmatprep.subr.bf16.mxu1 %v1962_v31  ;;  %v2013_v31 = vld [vmem:[#allocation4 + $0x3a8] ss:$12 sps:$4 sm:$0xff]  }
  0x7e   :  { %1165 = vmatpush1.bf16.msra.mxu0 %v1909_v18  ;;  %1317 = vmatmul.mubr.bf16.vlgmr.msra.gmra.mrb[4].mxu1 %v2232_v35  ;;  %v1989_v18 = vld [vmem:[#allocation4 + $0x318] ss:$12 sps:$4 sm:$0xff]  }
  0x7f   :  { %1166 = vmatprep.subr.bf16.mxu0 %v1916_v20  ;;  %1769 = vmatpush3.bf16.msra.mxu1 %v1963_v36  ;;  %v1994_v20 = vld [vmem:[#allocation4 + $0x330] ss:$12 sps:$4 sm:$0xff]   ;;  %v2019_v36 = vld [vmem:[#allocation4 + $0x3d8] ss:$12 sps:$4 sm:$0xff]  }
  0x80   :  { %1770 = vmatprep.subr.bf16.mxu1 %v1967_v37  ;;  %1356 = vmatprep.mubr.bf16.mxu1 %v143_v4  ;;  %v2024_v37 = vld [vmem:[#allocation4 + $0x3f4] ss:$12 sps:$4 sm:$0xff]  }
  0x82   :  { %1167 = vmatpush1.bf16.msra.mxu0 %v1914_v22  ;;  %v1999_v22 = vld [vmem:[#allocation4 + $0x348] ss:$12 sps:$4 sm:$0xff]  }
  0x83   :  { %1168 = vmatprep.subr.bf16.mxu0 %v1921_v23  ;;  %1771 = vmatpush3.bf16.msra.mxu1 %v1968_v40  ;;  %v2006_v23 = vld [vmem:[#allocation4 + $0x364] ss:$12 sps:$4 sm:$0xff]   ;;  %v2025_v40 = vld [vmem:[#allocation4 + $0x408] ss:$12 sps:$4 sm:$0xff]  }
  0x84   :  { %1772 = vmatprep.subr.bf16.mxu1 %v1972_v41  ;;  %v2030_v41 = vld [vmem:[#allocation4 + $0x424] ss:$12 sps:$4 sm:$0xff]  }
  0x86   :  { %1169 = vmatpush1.bf16.msra.mxu0 %v1919_v27  ;;  %v2007_v27 = vld [vmem:[#allocation4 + $0x378] ss:$12 sps:$4 sm:$0xff]  }
  0x87   :  { %1170 = vmatprep.subr.bf16.mxu0 %v1926_v28  ;;  %1773 = vmatpush3.bf16.msra.mxu1 %v1973_v43  ;;  %v2012_v28 = vld [vmem:[#allocation4 + $0x394] ss:$12 sps:$4 sm:$0xff]   ;;  %v2033_v43 = vld [vmem:[#allocation4 + $0x43c] ss:$12 sps:$4 sm:$0xff]  }
  0x88   :  { %1774 = vmatprep.subr.bf16.mxu1 %v1977_v45  ;;  %v2036_v45 = vld [vmem:[#allocation4 + $0x454] ss:$12 sps:$4 sm:$0xff]  }
  0x8a   :  { %1171 = vmatpush1.bf16.msra.mxu0 %v1924_v32  ;;  %v2018_v32 = vld [vmem:[#allocation4 + $0x3c4] ss:$12 sps:$4 sm:$0xff]  }
  0x8b   :  { %1172 = vmatprep.subr.bf16.mxu0 %v1931_v34  ;;  %1775 = vmatpush3.bf16.msra.mxu1 %v1978_v48  ;;  %v2016_v34 = vld [vmem:[#allocation4 + $0x3c0] ss:$12 sps:$4 sm:$0xff]   ;;  %v2037_v48 = vld [vmem:[#allocation4 + $0x468] ss:$12 sps:$4 sm:$0xff]  }
  0x8c   :  { %1776 = vmatprep.subr.bf16.mxu1 %v1982_v49 }
  0x8e   :  { %1173 = vmatpush1.bf16.msra.mxu0 %v1929_v38  ;;  %v2022_v38 = vld [vmem:[#allocation4 + $0x3f0] ss:$12 sps:$4 sm:$0xff]  }
  0x8f   :  { %1174 = vmatprep.subr.bf16.mxu0 %v1936_v39  ;;  %1777 = vmatpush3.bf16.msra.mxu1 %v1983_v52  ;;  %v2027_v39 = vld [vmem:[#allocation4 + $0x40c] ss:$12 sps:$4 sm:$0xff]  }
  0x90   :  { %1778 = vmatprep.subr.bf16.mxu1 %v1987_v53 }
  0x92   :  { %1175 = vmatpush1.bf16.msra.mxu0 %v1934_v42  ;;  %v2028_v42 = vld [vmem:[#allocation4 + $0x420] ss:$12 sps:$4 sm:$0xff]  }
  0x93   :  { %1176 = vmatprep.subr.bf16.mxu0 %v1941_v44  ;;  %1779 = vmatpush3.bf16.msra.mxu1 %v1988_v56  ;;  %v2031_v44 = vld [vmem:[#allocation4 + $0x438] ss:$12 sps:$4 sm:$0xff]  }
  0x94   :  { %1780 = vmatprep.subr.bf16.mxu1 %v1992_v57  ;;  %v2040_v57 = vld [vmem:[#allocation6] sm:$0xff]  }
  0x96   :  { %1177 = vmatpush1.bf16.msra.mxu0 %v1939_v46  ;;  %v2034_v46 = vld [vmem:[#allocation4 + $0x450] ss:$12 sps:$4 sm:$0xff]  }
  0x97   :  { %1178 = vmatprep.subr.bf16.mxu0 %v1946_v47  ;;  %1781 = vmatpush3.bf16.msra.mxu1 %v1993_v63  ;;  %v2039_v47 = vld [vmem:[#allocation4 + $0x46c] ss:$12 sps:$4 sm:$0xff]  }
  0x98   :  { %1782 = vmatprep.subr.bf16.mxu1 %v1997_v1 }
  0x9a   :  { %1179 = vmatpush1.bf16.msra.mxu0 %v1944_v50 }
  0x9b   :  { %1180 = vmatprep.subr.bf16.mxu0 %v1951_v51  ;;  %1783 = vmatpush3.bf16.msra.mxu1 %v1998_v6  ;;  %v2045_v6 = vld [vmem:[#allocation6 + $0x28] sm:$0xff]  }
  0x9c   :  { %1799 = vmatprep.subr.bf16.mxu1 %v2138_v58 }
  0x9e   :  { %1181 = vmatpush1.bf16.msra.mxu0 %v1949_v54  ;;  %1357 = vmatmul.mubr.bf16.vlgmr.msra.gmra.mrb[8].mxu1 %v2237_v8  ;;  %v348_v54 = vsub.s32 2, %v2215_v25 }
  0x9f   :  { %1182 = vmatprep.subr.bf16.mxu0 %v1956_v55  ;;  %v336_v55 = vld [vmem:[%s2257_s2] sm:$0x7]  ;;  %1800 = vmatpush3.bf16.msra.mxu1 %v2040_v57 }
  0xa0   :  { %v349_v56 = vrot.slane %v336_v55, %v348_v54  ;;  %1801 = vmatprep.subr.bf16.mxu1 %v2138_v58  ;;  %1815 = vmatprep.mubr.msk.bf16.mxu1 %vm2139_vm0, %v2138_v58 }
  0xa2   :  { %1183 = vmatpush1.bf16.msra.mxu0 %v1954_v60 }
  0xa3   :  { %1184 = vmatprep.subr.bf16.mxu0 %v1961_v0  ;;  %1802 = vmatpush3.bf16.msra.mxu1 %v2041_v62 }
  0xa4   :  { %1803 = vmatprep.subr.bf16.mxu1 %v2138_v58 }
  0xa6   :  { %1185 = vmatpush1.bf16.msra.mxu0 %v1959_v3  ;;  %v2042_v3 = vld [vmem:[#allocation6 + $0x10] sm:$0xff]  }
  0xa7   :  { %1186 = vmatprep.subr.bf16.mxu0 %v1966_v7  ;;  %1804 = vmatpush3.bf16.msra.mxu1 %v2042_v3  ;;  %v2046_v7 = vld [vmem:[#allocation6 + $0x30] sm:$0xff]  }
  0xa8   :  { %1805 = vmatprep.subr.bf16.mxu1 %v2138_v58 }
  0xaa   :  { %1187 = vmatpush1.bf16.msra.mxu0 %v1964_v33 }
  0xab   :  { %1188 = vmatprep.subr.bf16.mxu0 %v1971_v9 }
  0xae   :  { %1189 = vmatpush1.bf16.msra.mxu0 %v1969_v10 }
  0xaf   :  { %1190 = vmatprep.subr.bf16.mxu0 %v1976_v11 }
  0xb2   :  { %1191 = vmatpush1.bf16.msra.mxu0 %v1974_v12 }
  0xb3   :  { %1192 = vmatprep.subr.bf16.mxu0 %v1981_v13 }
  0xb6   :  { %1193 = vmatpush1.bf16.msra.mxu0 %v1979_v14  ;;  %v340_v14 = vsub.s32 0, %v2215_v25 }
  0xb7   :  { %1203 = vmatprep.subr.bf16.mxu0 %v1986_v15 }
  0xb8   :  { %v341_v15 = vrot.slane %v336_v55, %v340_v14 }
  0xb9   :  { %1195 = vmatmul.mubr.bf16.vlgmr.msra.gmra.mrb[0].mxu0 %v2232_v35  ;;  %v2021_v35 = vld [vmem:[#allocation4 + $0x3dc] ss:$12 sps:$4 sm:$0xff]  }
  0xba   :  { %1204 = vmatpush1.bf16.msra.mxu0 %v1984_v16  ;;  %1235 = vmatprep.mubr.bf16.mxu0 %v143_v4  ;;  %v2043_v4 = vld [vmem:[#allocation6 + $0x18] sm:$0xff]  }
  0xbb   :  { %1205 = vmatprep.subr.bf16.mxu0 %v1991_v17  ;;  %1806 = vmatpush3.bf16.msra.mxu1 %v2043_v4 }
  0xbc   :  { %1807 = vmatprep.subr.bf16.mxu1 %v2138_v58 }
  0xbe   :  { %1206 = vmatpush1.bf16.msra.mxu0 %v1989_v18 }
  0xbf   :  { %1207 = vmatprep.subr.bf16.mxu0 %v1996_v19  ;;  %1808 = vmatpush3.bf16.msra.mxu1 %v2044_v5 }
  0xc0   :  { %1809 = vmatprep.subr.bf16.mxu1 %v2138_v58 }
  0xc2   :  { %1208 = vmatpush1.bf16.msra.mxu0 %v1994_v20 }
  0xc3   :  { %1209 = vmatprep.subr.bf16.mxu0 %v2001_v21  ;;  %1810 = vmatpush3.bf16.msra.mxu1 %v2045_v6 }
  0xc4   :  { %1811 = vmatprep.subr.bf16.mxu1 %v2138_v58 }
  0xc6   :  { %1210 = vmatpush1.bf16.msra.mxu0 %v1999_v22  ;;  %v344_v22 = vsub.s32 1, %v2215_v25 }
  0xc7   :  { %1211 = vmatprep.subr.bf16.mxu0 %v2006_v23  ;;  %1812 = vmatpush3.bf16.msra.mxu1 %v2046_v7 }
  0xc8   :  { %1813 = vmatprep.subr.bf16.mxu1 %v2138_v58 }
  0xca   :  { %1212 = vmatpush1.bf16.msra.mxu0 %v2004_v24  ;;  %v345_v24 = vrot.slane %v336_v55, %v344_v22 }
  0xcb   :  { %1213 = vmatprep.subr.bf16.mxu0 %v2009_v26 }
  0xce   :  { %1214 = vmatpush1.bf16.msra.mxu0 %v2007_v27 }
  0xcf   :  { %1215 = vmatprep.subr.bf16.mxu0 %v2012_v28 }
  0xd2   :  { %1216 = vmatpush1.bf16.msra.mxu0 %v2010_v29 }
  0xd3   :  { %1217 = vmatprep.subr.bf16.mxu0 %v2015_v30 }
  0xd6   :  { %1218 = vmatpush1.bf16.msra.mxu0 %v2013_v31 }
  0xd7   :  { %1219 = vmatprep.subr.bf16.mxu0 %v2018_v32 }
  0xda   :  { %1220 = vmatpush1.bf16.msra.mxu0 %v2016_v34 }
  0xdb   :  { %1221 = vmatprep.subr.bf16.mxu0 %v2021_v35 }
  0xde   :  { %1222 = vmatpush1.bf16.msra.mxu0 %v2019_v36 }
  0xdf   :  { %1223 = vmatprep.subr.bf16.mxu0 %v2024_v37 }
  0xe2   :  { %1224 = vmatpush1.bf16.msra.mxu0 %v2022_v38 }
  0xe3   :  { %1225 = vmatprep.subr.bf16.mxu0 %v2027_v39  ;;  %v2140_v39 = vmov 1966171168  }
  0xe6   :  { %1226 = vmatpush1.bf16.msra.mxu0 %v2025_v40  ;;  %v1495_v40 = vunpack.c.l.s4 %v2140_v39 }
  0xe7   :  { %1227 = vmatprep.subr.bf16.mxu0 %v2030_v41 }
  0xe8   :  { %v1496_v41 = vunpack.c.0.s8 %v1495_v40 }
  0xea   :  { %1228 = vmatpush1.bf16.msra.mxu0 %v2028_v42  ;;  %v1713_v42 = vld [vmem:[%s2259_s4] ss:$0 sm:$0xff] }
  0xeb   :  { %1229 = vmatprep.subr.bf16.mxu0 %v2033_v43 }
  0xee   :  { %1230 = vmatpush1.bf16.msra.mxu0 %v2031_v44 }
  0xef   :  { %1231 = vmatprep.subr.bf16.mxu0 %v2036_v45  ;;  %v1499_v45 = vsub.s32 %v1496_v41, %v2215_v25 }
  0xf2   :  { %1232 = vmatpush1.bf16.msra.mxu0 %v2034_v46 }
  0xf3   :  { %1233 = vmatprep.subr.bf16.mxu0 %v2039_v47 }
  0xf6   :  { %1234 = vmatpush1.bf16.msra.mxu0 %v2037_v48 }
  0xf9   :  { %1236 = vmatmul.mubr.bf16.vlgmr.msra.gmra.mrb[0].mxu0 %v2237_v8  ;;  %v2047_v8 = vld [vmem:[#allocation6 + $0x38] sm:$0xff]  }
  0xfa   :  { %1814 = vmatpush3.bf16.msra.mxu1 %v2047_v8 }
 0x130   :  { %v1740_v49 = vpop.f32.mrb[0].mxu1 }
 0x131   :  { %v1741_v50 = vpop.f32.mrb[1].mxu1 }
 0x132   :  { %v1742_v51 = vadd.f32 %v1741_v50, %v1740_v49  ;;  %v1743_v52 = vpop.f32.mrb[2].mxu1 }
 0x133   :  { %v1744_v53 = vpop.f32.mrb[3].mxu1 }
 0x134   :  { %v1279_v59 = vadd.f32 %v1742_v51, %v349_v56 }
 0x151   :  { %v1762_v60 = vpop.f32.mrb[4].mxu1 }
 0x152   :  { %v1763_v61 = vpop.f32.mrb[5].mxu1 }
 0x153   :  { %v1764_v63 = vadd.f32 %v1763_v61, %v1762_v60  ;;  %v1765_v0 = vpop.f32.mrb[6].mxu1 }
 0x154   :  { %v1766_v1 = vpop.f32.mrb[7].mxu1 }
 0x155   :  { %v1319_v2 = vadd.f32 %v1764_v63, %v1279_v59 }
 0x171   :  { %v1784_v33 = vpop.f32.mrb[8].mxu1 }
 0x172   :  { %v1785_v9 = vpop.f32.mrb[9].mxu1 }
 0x173   :  { %v1786_v10 = vadd.f32 %v1785_v9, %v1784_v33  ;;  %v1787_v11 = vpop.f32.mrb[10].mxu1 }
 0x174   :  { %v1788_v12 = vpop.f32.mrb[11].mxu1 }
 0x175   :  { %v1359_v13 = vadd.f32 %v1786_v10, %v1319_v2 }
 0x177   :  { %v1712_v23 = vmul.f32 -1.442695, %v1359_v13 }
 0x1cc   :  { %v1237_v16 = vpop.f32.mrb[0].mxu0 }
 0x1cd   :  { %v1819_v17 = vadd.f32 %v1237_v16, %v341_v15  ;;  %v1239_v18 = vpop.f32.mrb[1].mxu0 }
 0x1ce   :  { %v1241_v19 = vpop.f32.mrb[2].mxu0  ;;  %v1820_v26 = vadd.f32 %v1239_v18, %v345_v24 }
 0x1cf   :  { %v1711_v20 = vmul.f32 -1.442695, %v1819_v17  ;;  %v1242_v21 = vpop.f32.mrb[3].mxu0 }
 0x1d1   :  { %2048 = vpow2.f32 %v1711_v20 }
 0x1d2   :  { %2050 = vpow2.f32 %v1712_v23 }
 0x1d3   :  { %2052 = vtanh.f32 %v1820_v26 }
 0x1db   :  { %v2049_v27 = vpop.eup %2048 }
 0x1dc   :  { %v1367_v28 = vadd.f32 1.0, %v2049_v27  ;;  %v2051_v29 = vpop.eup %2050 }
 0x1dd   :  { %v1374_v30 = vadd.f32 1.0, %v2051_v29  ;;  %v2053_v31 = vpop.eup %2052 }
 0x1de   :  { %2054 = vrcp.f32 %v1367_v28 }
 0x1df   :  { %2056 = vrcp.f32 %v1374_v30 }
 0x1e8   :  { %v2055_v32 = vpop.eup %2054 }
 0x1e9   :  { %v1377_v34 = vmul.f32 %v2055_v32, %v2053_v31  ;;  %v2057_v35 = vpop.eup %2056 }
 0x1eb   :  { %2058 = vtanh.f32 %v1377_v34 }
 0x1f5   :  { %v2059_v36 = vpop.eup %2058 }
 0x1f6   :  { %v1379_v37 = vmul.f32 %v2059_v36, %v2057_v35 }
 0x1f8   :  { %v1380_v38 = vpack.c.bf16 %v1379_v37, %v1379_v37 }
 0x1fa   :  { %1816 = vmatmul.mubr.bf16.vlgmr.msra.gmra.mrb[12].mxu1 %v1380_v38 }
 0x2cd   :  { %v1486_v43 = vpop.f32.mrb[12].mxu1 }
 0x2ce   :  { %v1487_v44 = vadd.f32 %v1713_v42, %v1486_v43  ;;  %v1817_v46 = vpop.f32.mrb[13].mxu1 }
 0x2cf   :  { %v1489_v47 = vpop.f32.mrb[14].mxu1 }
 0x2d0   :  { %v1492_v48 = vpack.c.bf16 %v1487_v44, %v1487_v44  ;;  %v1818_v49 = vpop.f32.mrb[15].mxu1 }
 0x2d2   :  { %v1500_v50 = vrot.slane %v1492_v48, %v1499_v45 }
 0x2d4   :  { %1722 = vst.sshfl [vmem:[#allocation7] sm:$0x1 pattern:$0x73625140] %v1500_v50 }
 0x2db   :  { %v1543_v51 = vld [vmem:[#allocation7] sm:$0x1] }
 0x2dc   :  { %1544 = vst [vmem:[%s2260_s5] sm:$0x1] %v1543_v51 }
 0x2dd   :  { %1561 = vsyncpa [#allocation3], 1 }
 0x2de   :  { %1562 = vsyncpa [#allocation5], 1 }

</bundles_post_ra>
